<compile_context>
chip_gen: v5e
topology: v5e:2x2
jax: 0.10.0
libtpu: 0.0.40
codegen_flags: <defaults>
</compile_context>

<pallas_src>
import functools

import jax
import jax.numpy as jnp
from jax.experimental import pallas as pl
from jax.experimental.pallas import tpu as pltpu


def _round_up(x, m):
    return ((x + m - 1) // m) * m


# ----------------------------------------------------------------------------
# Kernel
# ----------------------------------------------------------------------------
def tdm_critic_kernel(x_ref, a_ref,
                      w1x_ref, w1a_ref, b1_ref,
                      w2_ref, b2_ref,
                      w3_ref, b3_ref,
                      w4_ref, b4_ref,
                      q_ref, *, vec):
    cd = w2_ref.dtype  # compute dtype for MXU inputs (bf16)

    x = x_ref[...].astype(cd)
    a = a_ref[...].astype(cd)

    # fc1 on the "virtual concat": x @ W1[:d_xg] + a @ (W1[d_xg:] / max_action)
    h = (jnp.dot(x, w1x_ref[...], preferred_element_type=jnp.float32)
         + jnp.dot(a, w1a_ref[...], preferred_element_type=jnp.float32)
         + b1_ref[...])
    h = jnp.maximum(h, 0.0).astype(cd)

    h = jnp.dot(h, w2_ref[...], preferred_element_type=jnp.float32) + b2_ref[...]
    h = jnp.maximum(h, 0.0).astype(cd)

    h = jnp.dot(h, w3_ref[...], preferred_element_type=jnp.float32) + b3_ref[...]
    h = jnp.maximum(h, 0.0).astype(cd)

    q = jnp.dot(h, w4_ref[...], preferred_element_type=jnp.float32) + b4_ref[...]

    if vec:
        q_ref[...] = q
    else:
        q_ref[...] = jnp.mean(q, axis=-1, keepdims=True)


# ----------------------------------------------------------------------------
# One-time parameter preparation (hoisted out of the per-call path)
# ----------------------------------------------------------------------------
def prepare_params(params, obs_goal_dim, max_action, weight_dtype=jnp.bfloat16):
    """params: ((w1,b1),(w2,b2),(w3,b3),(w4,b4)) with w_i laid out (in, out).

    Splits w1 into the obs+goal rows and the action rows, folds the
    1/max_action scaling of the actions into the action rows, casts the
    weights to `weight_dtype` and reshapes biases to (1, out) f32.
    """
    (w1, b1), (w2, b2), (w3, b3), (w4, b4) = params
    w1x = w1[:obs_goal_dim, :].astype(weight_dtype)
    w1a = (w1[obs_goal_dim:, :] / jnp.float32(max_action)).astype(weight_dtype)
    return (
        w1x, w1a, b1.reshape(1, -1).astype(jnp.float32),
        w2.astype(weight_dtype), b2.reshape(1, -1).astype(jnp.float32),
        w3.astype(weight_dtype), b3.reshape(1, -1).astype(jnp.float32),
        w4.astype(weight_dtype), b4.reshape(1, -1).astype(jnp.float32),
    )


# ----------------------------------------------------------------------------
# Forward wrapper
# ----------------------------------------------------------------------------
def tdm_critic_forward(x, actions, prepped, *, vec=False, block_batch=512):
    """x: (B, obs+goal) f32, actions: (B, action) f32.

    Returns (B, goal) if vec else (B, 1), float32.
    """
    (w1x, w1a, b1, w2, b2, w3, b3, w4, b4) = prepped
    batch, in_x = x.shape
    act_dim = actions.shape[1]
    goal_dim = w4.shape[1]
    out_dim = goal_dim if vec else 1

    # Batch tiling: a single full-batch tile for small batches, otherwise
    # block_batch-row tiles (multiple of 256 -> good MXU utilization).
    if batch > block_batch:
        tb = block_batch
        b_pad = _round_up(batch, tb)
        if b_pad != batch:
            x = jnp.pad(x, ((0, b_pad - batch), (0, 0)))
            actions = jnp.pad(actions, ((0, b_pad - batch), (0, 0)))
    else:
        tb = batch
        b_pad = batch
    n_tiles = b_pad // tb

    row_map = lambda i: (i, 0)      # activations: tile i of the batch
    const_map = lambda i: (0, 0)    # weights/biases: VMEM-resident

    kernel = functools.partial(tdm_critic_kernel, vec=vec)

    out = pl.pallas_call(
        kernel,
        out_shape=jax.ShapeDtypeStruct((b_pad, out_dim), jnp.float32),
        grid_spec=pltpu.PrefetchScalarGridSpec(
            num_scalar_prefetch=0,
            grid=(n_tiles,),
            in_specs=[
                pl.BlockSpec((tb, in_x), row_map),
                pl.BlockSpec((tb, act_dim), row_map),
                pl.BlockSpec(w1x.shape, const_map),
                pl.BlockSpec(w1a.shape, const_map),
                pl.BlockSpec(b1.shape, const_map),
                pl.BlockSpec(w2.shape, const_map),
                pl.BlockSpec(b2.shape, const_map),
                pl.BlockSpec(w3.shape, const_map),
                pl.BlockSpec(b3.shape, const_map),
                pl.BlockSpec(w4.shape, const_map),
                pl.BlockSpec(b4.shape, const_map),
            ],
            out_specs=pl.BlockSpec((tb, out_dim), row_map),
        ),
        compiler_params=pltpu.CompilerParams(
            dimension_semantics=("parallel",),
        ),
    )(x, actions, w1x, w1a, b1, w2, b2, w3, b3, w4, b4)

    if b_pad != batch:
        out = out[:batch]
    return out


# ----------------------------------------------------------------------------
# Init (mimics torch.nn.Linear default: U[-1/sqrt(fan_in), +1/sqrt(fan_in)])
# ----------------------------------------------------------------------------
def init_params(key, in_dim, hidden, goal_dim):
    def linear(k, fan_in, fan_out):
        kw, kb = jax.random.split(k)
        bound = 1.0 / jnp.sqrt(fan_in)
        w = jax.random.uniform(kw, (fan_in, fan_out), jnp.float32, -bound, bound)
        b = jax.random.uniform(kb, (fan_out,), jnp.float32, -bound, bound)
        return w, b

    k1, k2, k3, k4 = jax.random.split(key, 4)
    return (
        linear(k1, in_dim, hidden),
        linear(k2, hidden, hidden),
        linear(k3, hidden, hidden),
        linear(k4, hidden, goal_dim),
    )


if __name__ == "__main__":
    # Small env_params: obs=10, goal=3, action=4, action_max=2.0, batch=2.
    obs_dim, goal_dim, act_dim = 10, 3, 4
    obs_goal = obs_dim + goal_dim
    in_dim = obs_goal + act_dim
    hidden = 256
    max_action = 2.0
    batch = 2

    key = jax.random.PRNGKey(0)
    k_x, k_a, k_p = jax.random.split(key, 3)
    x = jax.random.normal(k_x, (batch, obs_goal), jnp.float32)
    actions = max_action * jax.random.uniform(k_a, (batch, act_dim), jnp.float32, -1.0, 1.0)

    params = init_params(k_p, in_dim, hidden, goal_dim)
    prepped = prepare_params(params, obs_goal, max_action)  # one-time prep

    fwd_scalar = jax.jit(lambda x_, a_, p_: tdm_critic_forward(x_, a_, p_, vec=False))
    fwd_vec = jax.jit(lambda x_, a_, p_: tdm_critic_forward(x_, a_, p_, vec=True))

    q_scalar = jax.block_until_ready(fwd_scalar(x, actions, prepped))
    q_vec = jax.block_until_ready(fwd_vec(x, actions, prepped))

    assert q_scalar.shape == (batch, 1)
    assert q_vec.shape == (batch, goal_dim)

    # --- bf16-matched pure-JAX reference (same precision as the kernel) ---
    (w1x, w1a, b1r, w2c, b2r, w3c, b3r, w4c, b4r) = prepped
    cd = w2c.dtype
    h = (jnp.dot(x.astype(cd), w1x, preferred_element_type=jnp.float32)
         + jnp.dot(actions.astype(cd), w1a, preferred_element_type=jnp.float32) + b1r)
    h = jnp.maximum(h, 0.0).astype(cd)
    h = jnp.dot(h, w2c, preferred_element_type=jnp.float32) + b2r
    h = jnp.maximum(h, 0.0).astype(cd)
    h = jnp.dot(h, w3c, preferred_element_type=jnp.float32) + b3r
    h = jnp.maximum(h, 0.0).astype(cd)
    ref_q_bf16 = jnp.dot(h, w4c, preferred_element_type=jnp.float32) + b4r
    ref_scalar_bf16 = jnp.mean(ref_q_bf16, axis=-1, keepdims=True)

    assert jnp.allclose(q_vec, ref_q_bf16, atol=2e-3, rtol=2e-3), "vec mismatch (bf16 ref)"
    assert jnp.allclose(q_scalar, ref_scalar_bf16, atol=2e-3, rtol=2e-3), "scalar mismatch (bf16 ref)"

    # --- full-f32 torch-equivalent reference (loose tolerance for bf16 weights) ---
    (w1, b1), (w2, b2), (w3, b3), (w4, b4) = params
    inp = jnp.concatenate([x, actions / max_action], axis=1)
    h = jnp.maximum(inp @ w1 + b1, 0.0)
    h = jnp.maximum(h @ w2 + b2, 0.0)
    h = jnp.maximum(h @ w3 + b3, 0.0)
    ref_q_f32 = h @ w4 + b4
    ref_scalar_f32 = jnp.mean(ref_q_f32, axis=-1, keepdims=True)

    assert jnp.allclose(q_vec, ref_q_f32, atol=5e-2, rtol=5e-2), "vec mismatch (f32 ref)"
    assert jnp.allclose(q_scalar, ref_scalar_f32, atol=5e-2, rtol=5e-2), "scalar mismatch (f32 ref)"

    print("KERNEL_OK")
</pallas_src>

<mosaic_0001>
module attributes {stable_mosaic.version = 11 : i64} {
  func.func @tdm_critic_kernel(%arg0: i32, %arg1: memref<2x13xf32, #tpu.memory_space<vmem>>, %arg2: memref<2x4xf32, #tpu.memory_space<vmem>>, %arg3: memref<13x256xbf16, #tpu.memory_space<vmem>>, %arg4: memref<4x256xbf16, #tpu.memory_space<vmem>>, %arg5: memref<1x256xf32, #tpu.memory_space<vmem>>, %arg6: memref<256x256xbf16, #tpu.memory_space<vmem>>, %arg7: memref<1x256xf32, #tpu.memory_space<vmem>>, %arg8: memref<256x256xbf16, #tpu.memory_space<vmem>>, %arg9: memref<1x256xf32, #tpu.memory_space<vmem>>, %arg10: memref<256x3xbf16, #tpu.memory_space<vmem>>, %arg11: memref<1x3xf32, #tpu.memory_space<vmem>>, %arg12: memref<2x1xf32, #tpu.memory_space<vmem>>) attributes {dimension_semantics = [#tpu.dimension_semantics<parallel>], iteration_bounds = array<i64: 1>, scalar_prefetch = 0 : i64, scratch_operands = 0 : i64, tpu.core_type = #tpu.core_type<tc>, window_params = [{transform_indices = @transform_0, window_bounds = array<i64: 2, 13>}, {transform_indices = @transform_1, window_bounds = array<i64: 2, 4>}, {pipeline_mode = #tpu.pipeline_mode<synchronous>, transform_indices = @transform_2, window_bounds = array<i64: 13, 256>}, {pipeline_mode = #tpu.pipeline_mode<synchronous>, transform_indices = @transform_3, window_bounds = array<i64: 4, 256>}, {pipeline_mode = #tpu.pipeline_mode<synchronous>, transform_indices = @transform_4, window_bounds = array<i64: 1, 256>}, {pipeline_mode = #tpu.pipeline_mode<synchronous>, transform_indices = @transform_5, window_bounds = array<i64: 256, 256>}, {pipeline_mode = #tpu.pipeline_mode<synchronous>, transform_indices = @transform_6, window_bounds = array<i64: 1, 256>}, {pipeline_mode = #tpu.pipeline_mode<synchronous>, transform_indices = @transform_7, window_bounds = array<i64: 256, 256>}, {pipeline_mode = #tpu.pipeline_mode<synchronous>, transform_indices = @transform_8, window_bounds = array<i64: 1, 256>}, {pipeline_mode = #tpu.pipeline_mode<synchronous>, transform_indices = @transform_9, window_bounds = array<i64: 256, 3>}, {pipeline_mode = #tpu.pipeline_mode<synchronous>, transform_indices = @transform_10, window_bounds = array<i64: 1, 3>}, {transform_indices = @transform_11, window_bounds = array<i64: 2, 1>}]} {
    %c0 = arith.constant 0 : index
    %c0_0 = arith.constant 0 : index
    %0 = vector.load %arg1[%c0, %c0_0] : memref<2x13xf32, #tpu.memory_space<vmem>>, vector<2x13xf32>
    %1 = arith.truncf %0 : vector<2x13xf32> to vector<2x13xbf16>
    %c0_1 = arith.constant 0 : index
    %c0_2 = arith.constant 0 : index
    %2 = vector.load %arg2[%c0_1, %c0_2] : memref<2x4xf32, #tpu.memory_space<vmem>>, vector<2x4xf32>
    %3 = arith.truncf %2 : vector<2x4xf32> to vector<2x4xbf16>
    %c0_3 = arith.constant 0 : index
    %c0_4 = arith.constant 0 : index
    %4 = vector.load %arg3[%c0_3, %c0_4] : memref<13x256xbf16, #tpu.memory_space<vmem>>, vector<13x256xbf16>
    %cst = arith.constant dense<0.000000e+00> : vector<2x256xf32>
    %5 = tpu.matmul %1, %4, %cst {dimension_numbers = #tpu.dot_dimension_numbers<[1], [0], [0], [1], [0, 0, 1, 1], [], []>} : vector<2x13xbf16>, vector<13x256xbf16>, vector<2x256xf32> -> vector<2x256xf32>
    %c0_5 = arith.constant 0 : index
    %c0_6 = arith.constant 0 : index
    %6 = vector.load %arg4[%c0_5, %c0_6] : memref<4x256xbf16, #tpu.memory_space<vmem>>, vector<4x256xbf16>
    %cst_7 = arith.constant dense<0.000000e+00> : vector<2x256xf32>
    %7 = tpu.matmul %3, %6, %cst_7 {dimension_numbers = #tpu.dot_dimension_numbers<[1], [0], [0], [1], [0, 0, 1, 1], [], []>} : vector<2x4xbf16>, vector<4x256xbf16>, vector<2x256xf32> -> vector<2x256xf32>
    %8 = arith.addf %5, %7 : vector<2x256xf32>
    %c0_8 = arith.constant 0 : index
    %c0_9 = arith.constant 0 : index
    %9 = vector.load %arg5[%c0_8, %c0_9] : memref<1x256xf32, #tpu.memory_space<vmem>>, vector<1x256xf32>
    %10 = vector.broadcast %9 : vector<1x256xf32> to vector<2x256xf32>
    %11 = arith.addf %8, %10 : vector<2x256xf32>
    %cst_10 = arith.constant 0.000000e+00 : f32
    %12 = vector.broadcast %cst_10 : f32 to vector<2x256xf32>
    %13 = arith.maximumf %11, %12 : vector<2x256xf32>
    %14 = arith.truncf %13 : vector<2x256xf32> to vector<2x256xbf16>
    %c0_11 = arith.constant 0 : index
    %c0_12 = arith.constant 0 : index
    %15 = vector.load %arg6[%c0_11, %c0_12] : memref<256x256xbf16, #tpu.memory_space<vmem>>, vector<256x256xbf16>
    %cst_13 = arith.constant dense<0.000000e+00> : vector<2x256xf32>
    %16 = tpu.matmul %14, %15, %cst_13 {dimension_numbers = #tpu.dot_dimension_numbers<[1], [0], [0], [1], [0, 0, 1, 1], [], []>} : vector<2x256xbf16>, vector<256x256xbf16>, vector<2x256xf32> -> vector<2x256xf32>
    %c0_14 = arith.constant 0 : index
    %c0_15 = arith.constant 0 : index
    %17 = vector.load %arg7[%c0_14, %c0_15] : memref<1x256xf32, #tpu.memory_space<vmem>>, vector<1x256xf32>
    %18 = vector.broadcast %17 : vector<1x256xf32> to vector<2x256xf32>
    %19 = arith.addf %16, %18 : vector<2x256xf32>
    %cst_16 = arith.constant 0.000000e+00 : f32
    %20 = vector.broadcast %cst_16 : f32 to vector<2x256xf32>
    %21 = arith.maximumf %19, %20 : vector<2x256xf32>
    %22 = arith.truncf %21 : vector<2x256xf32> to vector<2x256xbf16>
    %c0_17 = arith.constant 0 : index
    %c0_18 = arith.constant 0 : index
    %23 = vector.load %arg8[%c0_17, %c0_18] : memref<256x256xbf16, #tpu.memory_space<vmem>>, vector<256x256xbf16>
    %cst_19 = arith.constant dense<0.000000e+00> : vector<2x256xf32>
    %24 = tpu.matmul %22, %23, %cst_19 {dimension_numbers = #tpu.dot_dimension_numbers<[1], [0], [0], [1], [0, 0, 1, 1], [], []>} : vector<2x256xbf16>, vector<256x256xbf16>, vector<2x256xf32> -> vector<2x256xf32>
    %c0_20 = arith.constant 0 : index
    %c0_21 = arith.constant 0 : index
    %25 = vector.load %arg9[%c0_20, %c0_21] : memref<1x256xf32, #tpu.memory_space<vmem>>, vector<1x256xf32>
    %26 = vector.broadcast %25 : vector<1x256xf32> to vector<2x256xf32>
    %27 = arith.addf %24, %26 : vector<2x256xf32>
    %cst_22 = arith.constant 0.000000e+00 : f32
    %28 = vector.broadcast %cst_22 : f32 to vector<2x256xf32>
    %29 = arith.maximumf %27, %28 : vector<2x256xf32>
    %30 = arith.truncf %29 : vector<2x256xf32> to vector<2x256xbf16>
    %c0_23 = arith.constant 0 : index
    %c0_24 = arith.constant 0 : index
    %31 = vector.load %arg10[%c0_23, %c0_24] : memref<256x3xbf16, #tpu.memory_space<vmem>>, vector<256x3xbf16>
    %cst_25 = arith.constant dense<0.000000e+00> : vector<2x3xf32>
    %32 = tpu.matmul %30, %31, %cst_25 {dimension_numbers = #tpu.dot_dimension_numbers<[1], [0], [0], [1], [0, 0, 1, 1], [], []>} : vector<2x256xbf16>, vector<256x3xbf16>, vector<2x3xf32> -> vector<2x3xf32>
    %c0_26 = arith.constant 0 : index
    %c0_27 = arith.constant 0 : index
    %33 = vector.load %arg11[%c0_26, %c0_27] : memref<1x3xf32, #tpu.memory_space<vmem>>, vector<1x3xf32>
    %34 = vector.broadcast %33 : vector<1x3xf32> to vector<2x3xf32>
    %35 = arith.addf %32, %34 : vector<2x3xf32>
    %cst_28 = arith.constant dense<0.000000e+00> : vector<2xf32>
    %36 = vector.multi_reduction <add>, %35, %cst_28 [1] : vector<2x3xf32> to vector<2xf32>
    %37 = vector.shape_cast %36 : vector<2xf32> to vector<2x1xf32>
    %cst_29 = arith.constant 3.000000e+00 : f32
    %38 = vector.broadcast %cst_29 : f32 to vector<2x1xf32>
    %39 = arith.divf %37, %38 : vector<2x1xf32>
    %c0_30 = arith.constant 0 : index
    %c0_31 = arith.constant 0 : index
    %40 = vector.load %arg12[%c0_30, %c0_31] : memref<2x1xf32, #tpu.memory_space<vmem>>, vector<2x1xf32>
    tpu.vector_store %arg12[%c0_30, %c0_31], %39 {strides = array<i32>} : memref<2x1xf32, #tpu.memory_space<vmem>>, vector<2x1xf32>,
    return
  }
  func.func @transform_0(%arg0: i32) -> (i32, i32) {
    %c0_i32 = arith.constant 0 : i32
    %c0_i32_0 = arith.constant 0 : i32
    return %arg0, %c0_i32 : i32, i32
  }
  func.func @transform_1(%arg0: i32) -> (i32, i32) {
    %c0_i32 = arith.constant 0 : i32
    %c0_i32_0 = arith.constant 0 : i32
    return %arg0, %c0_i32 : i32, i32
  }
  func.func @transform_2(%arg0: i32) -> (i32, i32) {
    %c0_i32 = arith.constant 0 : i32
    %c0_i32_0 = arith.constant 0 : i32
    %c0_i32_1 = arith.constant 0 : i32
    return %c0_i32, %c0_i32_0 : i32, i32
  }
  func.func @transform_3(%arg0: i32) -> (i32, i32) {
    %c0_i32 = arith.constant 0 : i32
    %c0_i32_0 = arith.constant 0 : i32
    %c0_i32_1 = arith.constant 0 : i32
    return %c0_i32, %c0_i32_0 : i32, i32
  }
  func.func @transform_4(%arg0: i32) -> (i32, i32) {
    %c0_i32 = arith.constant 0 : i32
    %c0_i32_0 = arith.constant 0 : i32
    %c0_i32_1 = arith.constant 0 : i32
    return %c0_i32, %c0_i32_0 : i32, i32
  }
  func.func @transform_5(%arg0: i32) -> (i32, i32) {
    %c0_i32 = arith.constant 0 : i32
    %c0_i32_0 = arith.constant 0 : i32
    %c0_i32_1 = arith.constant 0 : i32
    return %c0_i32, %c0_i32_0 : i32, i32
  }
  func.func @transform_6(%arg0: i32) -> (i32, i32) {
    %c0_i32 = arith.constant 0 : i32
    %c0_i32_0 = arith.constant 0 : i32
    %c0_i32_1 = arith.constant 0 : i32
    return %c0_i32, %c0_i32_0 : i32, i32
  }
  func.func @transform_7(%arg0: i32) -> (i32, i32) {
    %c0_i32 = arith.constant 0 : i32
    %c0_i32_0 = arith.constant 0 : i32
    %c0_i32_1 = arith.constant 0 : i32
    return %c0_i32, %c0_i32_0 : i32, i32
  }
  func.func @transform_8(%arg0: i32) -> (i32, i32) {
    %c0_i32 = arith.constant 0 : i32
    %c0_i32_0 = arith.constant 0 : i32
    %c0_i32_1 = arith.constant 0 : i32
    return %c0_i32, %c0_i32_0 : i32, i32
  }
  func.func @transform_9(%arg0: i32) -> (i32, i32) {
    %c0_i32 = arith.constant 0 : i32
    %c0_i32_0 = arith.constant 0 : i32
    %c0_i32_1 = arith.constant 0 : i32
    return %c0_i32, %c0_i32_0 : i32, i32
  }
  func.func @transform_10(%arg0: i32) -> (i32, i32) {
    %c0_i32 = arith.constant 0 : i32
    %c0_i32_0 = arith.constant 0 : i32
    %c0_i32_1 = arith.constant 0 : i32
    return %c0_i32, %c0_i32_0 : i32, i32
  }
  func.func @transform_11(%arg0: i32) -> (i32, i32) {
    %c0_i32 = arith.constant 0 : i32
    %c0_i32_0 = arith.constant 0 : i32
    return %arg0, %c0_i32 : i32, i32
  }
}

</mosaic_0001>

<bundles_post_ra>
// kernel: _lambda_.1
= control target key start
LH: loop header
LB: loop body
LE: loop exit
PB: predicated region body
PF: predicated region fallthrough
CT: control target
= control target key end

     0   :  { %16 = vsyncpa [#allocation3], 0  ;;  %s1496_s0 = inlined_call_operand.vmem [shape: f32[2,13], index: 0, kind: input, shape index: {}]   ;;  %s1497_s1 = inlined_call_operand.vmem [shape: f32[2,4], index: 1, kind: input, shape index: {}]   ;;  %s1498_s2 = inlined_call_operand.vmem [shape: bf16[13,256], index: 2, kind: input, shape index: {}]   ;;  %s1499_s3 = inlined_call_operand.vmem [shape: bf16[4,256], index: 3, kind: input, shape index: {}]   ;;  %s1500_s4 = inlined_call_operand.vmem [shape: f32[1,256], index: 4, kind: input, shape index: {}]   ;;  %s1501_s5 = inlined_call_operand.hbm [shape: bf16[256,256], index: 5, kind: input, shape index: {}]   ;;  %s1502_s6 = inlined_call_operand.vmem [shape: f32[1,256], index: 6, kind: input, shape index: {}]   ;;  %s1503_s7 = inlined_call_operand.hbm [shape: bf16[256,256], index: 7, kind: input, shape index: {}]   ;;  %s1504_s8 = inlined_call_operand.vmem [shape: f32[1,256], index: 8, kind: input, shape index: {}]   ;;  %s1505_s9 = inlined_call_operand.vmem [shape: bf16[256,3], index: 9, kind: input, shape index: {}]   ;;  %s1506_s10 = inlined_call_operand.vmem [shape: f32[1,3], index: 10, kind: input, shape index: {}]   ;;  %s1507_s11 = inlined_call_operand.vmem [shape: f32[2,1], index: 11, kind: output, shape index: {}]  }
   0x1   :  { %s32_s19 = sshll.u32 %s1501_s5, 4  ;;  %s33_s19 = int_to_ptr.hbm [resolvable:$true] %s32_s19 }
   0x2   :  { %17 = vsyncpa [#allocation5], 0  ;;  %s1338_s20 = smov [#allocation2]   ;;  %s47_s24 = sshll.u32 %s1503_s7, 4  ;;  %s48_s24 = int_to_ptr.hbm [resolvable:$true] %s47_s24 }
   0x3   :  { %s34_s21 = sshll.u32 %s1338_s20, 4  ;;  %s1339_s25 = smov 128   ;;  %s35_s21 = int_to_ptr.vmem [resolvable:$true] %s34_s21 }
   0x4   :  { %s1340_s26 = smov 8   ;;  %s1341_s27 = smov [#allocation4]  }
   0x5   :  { %40 = dma.hbm_to_vmem [thread:$0]  %s33_s19, 4096, %s35_s21, [#allocation3], %s1339_s25, %s1339_s25, %s1340_s26  }
   0x6   :  { %s49_s28 = sshll.u32 %s1341_s27, 4  ;;  %s50_s28 = int_to_ptr.vmem [resolvable:$true] %s49_s28 }
   0x7   :  { %55 = dma.hbm_to_vmem [thread:$0]  %s48_s24, 4096, %s50_s28, [#allocation5], %s1339_s25, %s1339_s25, %s1340_s26  }
   0x8   :  { %1334 = dma.done.wait [#allocation3], 4096  }
   0x9   :  { %1335 = vsyncadd [#allocation3], 4294963200 }
   0xa   :  { %1336 = dma.done.wait [#allocation5], 4096  }
   0xb   :  { %1337 = vsyncadd [#allocation5], 4294963200  ;;  %vm129_vm0 = vcmask 1045504   ;;  %v77_v0 = vld [vmem:[%s1499_s3] sm:$0xf]  ;;  %vm130_vm1 = vcmask 1046528  }
   0xc   :  { %v867_v1 = vld [vmem:[%s1498_s2] sm:$0xf]  ;;  %v1342_v2 = vmov 65535   ;;  %79 = vst [vmem:[#allocation1] ss:$4 sm:$0xff] %v77_v0  ;;  %vm86_vm2 = vcmask 1041408  }
   0xd   :  { %v131_v3 = vsel %vm129_vm0, 4294967295, %v1342_v2  ;;  %v1196_v4 = vld [vmem:[%s1498_s2 + $0x4] sm:$0x70]  ;;  %v1195_v5 = vld [vmem:[%s1498_s2 + $0x4] sm:$0xf]  ;;  %vm82_vm3 = vcmask 31744  }
   0xe   :  { %v869_v6 = vld [vmem:[%s1498_s2 + $0x8] sm:$0x70]  ;;  %v933_v7 = vld [vmem:[#allocation2 + $0x70] sm:$0xf]  ;;  %v868_v8 = vor.u32 %v1196_v4, %v867_v1  ;;  %v1212_v10 = vld [vmem:[#allocation2 + $0x74] sm:$0xf0] }
   0xf   :  { %v872_v9 = vor.u32 %v1195_v5, %v869_v6  ;;  %v997_v11 = vld [vmem:[#allocation2 + $0xf0] sm:$0xf]  ;;  %v1228_v12 = vld [vmem:[#allocation2 + $0xf4] sm:$0xf0]  ;;  %v132_v13 = vsel %vm130_vm1, %v131_v3, 0  ;;  %v934_v14 = vor.u32 %v1212_v10, %v933_v7  ;;  %vm125_vm4 = vcmask 105472  }
  0x10   :  { %v998_v15 = vor.u32 %v1228_v12, %v997_v11  ;;  %v73_v16 = vld [vmem:[%s1497_s1] sm:$0x3]  ;;  %v925_v17 = vld [vmem:[#allocation2 + $0x60] sm:$0xf]  ;;  %v1210_v18 = vld [vmem:[#allocation2 + $0x64] sm:$0xf0]  ;;  %v134_v22 = vand.u32 %v868_v8, %v132_v13 }
  0x11   :  { %375 = vmatpush.bf16.msra.mxu0 %v934_v14  ;;  %v1211_v19 = vld [vmem:[#allocation2 + $0x74] sm:$0xf]  ;;  %v989_v20 = vld [vmem:[#allocation2 + $0xe0] sm:$0xf]  ;;  %v1226_v21 = vld [vmem:[#allocation2 + $0xe4] sm:$0xf0]  ;;  %v137_v23 = vand.u32 %v872_v9, %v132_v13  ;;  %v926_v29 = vor.u32 %v1210_v18, %v925_v17  ;;  %v74_v33 = vpack.c.bf16 %v73_v16, %v73_v16 }
  0x12   :  { %388 = vmatpush.bf16.msra.mxu1 %v998_v15  ;;  %v935_v24 = vld [vmem:[#allocation2 + $0x78] sm:$0xf0]  ;;  %v1227_v25 = vld [vmem:[#allocation2 + $0xf4] sm:$0xf]  ;;  %v990_v30 = vor.u32 %v1226_v21, %v989_v20  ;;  %v1209_v36 = vld [vmem:[#allocation2 + $0x64] sm:$0xf] }
  0x13   :  { %v999_v26 = vld [vmem:[#allocation2 + $0xf8] sm:$0xf0]  ;;  %v81_v28 = vld.sshfl [vmem:[#allocation1 + $0x8] sm:$0xff pattern:$0x73625140]  ;;  %v938_v34 = vor.u32 %v1211_v19, %v935_v24  ;;  %vm843_vm5 = vcmask 17408  }
  0x14   :  { %v80_v27 = vld.sshfl [vmem:[#allocation1] sm:$0xff pattern:$0x73625140]  ;;  %v89_v32 = vsel %vm86_vm2, %v81_v28, 0  ;;  %v1002_v35 = vor.u32 %v1227_v25, %v999_v26  ;;  %v927_v37 = vld [vmem:[#allocation2 + $0x68] sm:$0xf0] }
  0x15   :  { %v87_v31 = vsel %vm86_vm2, %v80_v27, 0  ;;  %111 = vmatpush.bf16.msra.mxu3 %v89_v32  ;;  %v1225_v38 = vld [vmem:[#allocation2 + $0xe4] sm:$0xf]  ;;  %v991_v39 = vld [vmem:[#allocation2 + $0xe8] sm:$0xf0]  ;;  %376 = vmatpush.bf16.msra.mxu0 %v926_v29  ;;  %v930_v40 = vor.u32 %v1209_v36, %v927_v37  ;;  %vm855_vm7 = vcmask 1024  }
  0x16   :  { %98 = vmatpush.bf16.msra.mxu2 %v87_v31  ;;  %389 = vmatpush.bf16.msra.mxu1 %v990_v30  ;;  %v994_v41 = vor.u32 %v1225_v38, %v991_v39  ;;  %v71_v42 = vld [vmem:[%s1496_s0] sm:$0x3]  ;;  %v917_v44 = vld [vmem:[#allocation2 + $0x50] sm:$0xf]  ;;  %v1207_v49 = vld [vmem:[#allocation2 + $0x54] sm:$0xf] }
  0x17   :  { %v72_v43 = vpack.c.bf16 %v71_v42, %v71_v42  ;;  %v1208_v45 = vld [vmem:[#allocation2 + $0x54] sm:$0xf0]  ;;  %v981_v46 = vld [vmem:[#allocation2 + $0xd0] sm:$0xf]  ;;  %v919_v50 = vld [vmem:[#allocation2 + $0x58] sm:$0xf0] }
  0x18   :  { %864 = vmatmul.msk.bf16.vlgmr.msra.gmra.mxu3 %vm82_vm3, %v74_v33  ;;  %v918_v47 = vor.u32 %v1208_v45, %v917_v44  ;;  %v1224_v48 = vld [vmem:[#allocation2 + $0xd4] sm:$0xf0]  ;;  %v922_v52 = vor.u32 %v1207_v49, %v919_v50  ;;  %v1223_v53 = vld [vmem:[#allocation2 + $0xd4] sm:$0xf]  ;;  %v983_v54 = vld [vmem:[#allocation2 + $0xd8] sm:$0xf0] }
  0x19   :  { %159 = vmatpush.bf16.msrb.mxu3 %v137_v23  ;;  %863 = vmatmul.msk.bf16.vlgmr.msra.gmra.mxu2 %vm82_vm3, %v74_v33  ;;  %v982_v51 = vor.u32 %v1224_v48, %v981_v46  ;;  %v909_v55 = vld [vmem:[#allocation2 + $0x40] sm:$0xf]  ;;  %v986_v56 = vor.u32 %v1223_v53, %v983_v54  ;;  %v1206_v57 = vld [vmem:[#allocation2 + $0x44] sm:$0xf0]  ;;  %v1205_v62 = vld [vmem:[#allocation2 + $0x44] sm:$0xf] }
  0x1a   :  { %146 = vmatpush.bf16.msrb.mxu2 %v134_v22  ;;  %377 = vmatpush.bf16.msra.mxu0 %v918_v47  ;;  %v973_v58 = vld [vmem:[#allocation2 + $0xc0] sm:$0xf]  ;;  %v1222_v59 = vld [vmem:[#allocation2 + $0xc4] sm:$0xf0]  ;;  %v910_v60 = vor.u32 %v1206_v57, %v909_v55  ;;  %v911_v63 = vld [vmem:[#allocation2 + $0x48] sm:$0xf0] }
  0x1b   :  { %390 = vmatpush.bf16.msra.mxu1 %v982_v51  ;;  %v974_v61 = vor.u32 %v1222_v59, %v973_v58  ;;  %v1221_v0 = vld [vmem:[#allocation2 + $0xc4] sm:$0xf]  ;;  %v914_v1 = vor.u32 %v1205_v62, %v911_v63  ;;  %v975_v2 = vld [vmem:[#allocation2 + $0xc8] sm:$0xf0]  ;;  %v901_v4 = vld [vmem:[#allocation2 + $0x30] sm:$0xf] }
  0x1c   :  { %v978_v3 = vor.u32 %v1221_v0, %v975_v2  ;;  %v1204_v5 = vld [vmem:[#allocation2 + $0x34] sm:$0xf0]  ;;  %v965_v6 = vld [vmem:[#allocation2 + $0xb0] sm:$0xf]  ;;  %v1203_v9 = vld [vmem:[#allocation2 + $0x34] sm:$0xf] }
  0x1d   :  { %414 = vmatpush.bf16.msra.mxu3 %v1002_v35  ;;  %v902_v7 = vor.u32 %v1204_v5, %v901_v4  ;;  %v1220_v8 = vld [vmem:[#allocation2 + $0xb4] sm:$0xf0]  ;;  %v903_v10 = vld [vmem:[#allocation2 + $0x38] sm:$0xf0]  ;;  %v1219_v13 = vld [vmem:[#allocation2 + $0xb4] sm:$0xf] }
  0x1e   :  { %401 = vmatpush.bf16.msra.mxu2 %v938_v34  ;;  %378 = vmatpush.bf16.msra.mxu0 %v910_v60  ;;  %v966_v11 = vor.u32 %v1220_v8, %v965_v6  ;;  %v906_v12 = vor.u32 %v1203_v9, %v903_v10  ;;  %v967_v14 = vld [vmem:[#allocation2 + $0xb8] sm:$0xf0]  ;;  %v893_v15 = vld [vmem:[#allocation2 + $0x20] sm:$0xf]  ;;  %v1202_v17 = vld [vmem:[#allocation2 + $0x24] sm:$0xf0] }
  0x1f   :  { %391 = vmatpush.bf16.msra.mxu1 %v974_v61  ;;  %v970_v16 = vor.u32 %v1219_v13, %v967_v14  ;;  %v957_v18 = vld [vmem:[#allocation2 + $0xa0] sm:$0xf]  ;;  %v1218_v19 = vld [vmem:[#allocation2 + $0xa4] sm:$0xf0]  ;;  %v894_v20 = vor.u32 %v1202_v17, %v893_v15  ;;  %v1201_v22 = vld [vmem:[#allocation2 + $0x24] sm:$0xf] }
  0x20   :  { %v958_v21 = vor.u32 %v1218_v19, %v957_v18  ;;  %v895_v23 = vld [vmem:[#allocation2 + $0x28] sm:$0xf0]  ;;  %v1217_v24 = vld [vmem:[#allocation2 + $0xa4] sm:$0xf]  ;;  %v885_v28 = vld [vmem:[#allocation2 + $0x10] sm:$0xf] }
  0x21   :  { %415 = vmatpush.bf16.msra.mxu3 %v994_v41  ;;  %v898_v25 = vor.u32 %v1201_v22, %v895_v23  ;;  %v959_v26 = vld [vmem:[#allocation2 + $0xa8] sm:$0xf0]  ;;  %v1200_v29 = vld [vmem:[#allocation2 + $0x14] sm:$0xf0]  ;;  %v949_v30 = vld [vmem:[#allocation2 + $0x90] sm:$0xf] }
  0x22   :  { %402 = vmatpush.bf16.msra.mxu2 %v930_v40  ;;  %379 = vmatpush.bf16.msra.mxu0 %v902_v7  ;;  %v962_v27 = vor.u32 %v1217_v24, %v959_v26  ;;  %v886_v31 = vor.u32 %v1200_v29, %v885_v28  ;;  %v1216_v32 = vld [vmem:[#allocation2 + $0x94] sm:$0xf0]  ;;  %v1199_v33 = vld [vmem:[#allocation2 + $0x14] sm:$0xf]  ;;  %v887_v34 = vld [vmem:[#allocation2 + $0x18] sm:$0xf0] }
  0x23   :  { %392 = vmatpush.bf16.msra.mxu1 %v966_v11  ;;  %v950_v35 = vor.u32 %v1216_v32, %v949_v30  ;;  %v890_v36 = vor.u32 %v1199_v33, %v887_v34  ;;  %v1215_v37 = vld [vmem:[#allocation2 + $0x94] sm:$0xf]  ;;  %v951_v38 = vld [vmem:[#allocation2 + $0x98] sm:$0xf0]  ;;  %v877_v39 = vld [vmem:[#allocation2] sm:$0xf] }
  0x24   :  { %v954_v40 = vor.u32 %v1215_v37, %v951_v38  ;;  %v1198_v41 = vld [vmem:[#allocation2 + $0x4] sm:$0xf0]  ;;  %v941_v42 = vld [vmem:[#allocation2 + $0x80] sm:$0xf]  ;;  %v1197_v46 = vld [vmem:[#allocation2 + $0x4] sm:$0xf] }
  0x25   :  { %416 = vmatpush.bf16.msra.mxu3 %v986_v56  ;;  %v878_v44 = vor.u32 %v1198_v41, %v877_v39  ;;  %v879_v47 = vld [vmem:[#allocation2 + $0x8] sm:$0xf0]  ;;  %v1213_v48 = vld [vmem:[#allocation2 + $0x84] sm:$0xf]  ;;  %v1244_v53 = vld [vmem:[#allocation4 + $0x74] sm:$0xf0] }
  0x26   :  { %403 = vmatpush.bf16.msra.mxu2 %v922_v52  ;;  %380 = vmatpush.bf16.msra.mxu0 %v894_v20  ;;  %v882_v49 = vor.u32 %v1197_v46, %v879_v47  ;;  %v943_v50 = vld [vmem:[#allocation2 + $0x88] sm:$0xf0]  ;;  %v1061_v52 = vld [vmem:[#allocation4 + $0x70] sm:$0xf]  ;;  %v1243_v54 = vld [vmem:[#allocation4 + $0x74] sm:$0xf] }
  0x27   :  { %393 = vmatpush.bf16.msra.mxu1 %v958_v21  ;;  %v946_v51 = vor.u32 %v1213_v48, %v943_v50  ;;  %v1062_v55 = vor.u32 %v1244_v53, %v1061_v52  ;;  %v1063_v56 = vld [vmem:[#allocation4 + $0x78] sm:$0xf0]  ;;  %v1053_v57 = vld [vmem:[#allocation4 + $0x60] sm:$0xf]  ;;  %v1242_v58 = vld [vmem:[#allocation4 + $0x64] sm:$0xf0] }
  0x28   :  { %874 = vmatmul.msk.bf16.vlgmr.msrb.gmra.mxu3 %vm125_vm4, %v72_v43  ;;  %v1066_v59 = vor.u32 %v1243_v54, %v1063_v56  ;;  %v1241_v60 = vld [vmem:[#allocation4 + $0x64] sm:$0xf]  ;;  %v1055_v61 = vld [vmem:[#allocation4 + $0x68] sm:$0xf0]  ;;  %v1125_v62 = vld [vmem:[#allocation4 + $0xf0] sm:$0xf]  ;;  %v1054_v63 = vor.u32 %v1242_v58, %v1053_v57 }
  0x29   :  { %873 = vmatmul.msk.bf16.vlgmr.msrb.gmra.mxu2 %vm125_vm4, %v72_v43  ;;  %417 = vmatpush.bf16.msra.mxu3 %v978_v3  ;;  %v1214_v43 = vld [vmem:[#allocation2 + $0x84] sm:$0xf0]  ;;  %v1260_v0 = vld [vmem:[#allocation4 + $0xf4] sm:$0xf0]  ;;  %v1127_v2 = vld [vmem:[#allocation4 + $0xf8] sm:$0xf0]  ;;  %v1058_v3 = vor.u32 %v1241_v60, %v1055_v61 }
  0x2a   :  { %404 = vmatpush.bf16.msra.mxu2 %v914_v1  ;;  %381 = vmatpush.bf16.msra.mxu0 %v886_v31  ;;  %v942_v45 = vor.u32 %v1214_v43, %v941_v42  ;;  %v1259_v1 = vld [vmem:[#allocation4 + $0xf4] sm:$0xf]  ;;  %v1126_v4 = vor.u32 %v1260_v0, %v1125_v62  ;;  %v1045_v6 = vld [vmem:[#allocation4 + $0x50] sm:$0xf]  ;;  %v1240_v7 = vld [vmem:[#allocation4 + $0x54] sm:$0xf0] }
  0x2b   :  { %394 = vmatpush.bf16.msra.mxu1 %v950_v35  ;;  %v1130_v5 = vor.u32 %v1259_v1, %v1127_v2  ;;  %v1239_v8 = vld [vmem:[#allocation4 + $0x54] sm:$0xf]  ;;  %v1047_v9 = vld [vmem:[#allocation4 + $0x58] sm:$0xf0]  ;;  %v1117_v10 = vld [vmem:[#allocation4 + $0xe0] sm:$0xf]  ;;  %v1046_v17 = vor.u32 %v1240_v7, %v1045_v6 }
  0x2c   :  { %v1258_v11 = vld [vmem:[#allocation4 + $0xe4] sm:$0xf0]  ;;  %v1257_v15 = vld [vmem:[#allocation4 + $0xe4] sm:$0xf]  ;;  %v1037_v19 = vld [vmem:[#allocation4 + $0x40] sm:$0xf]  ;;  %v1050_v21 = vor.u32 %v1239_v8, %v1047_v9 }
  0x2d   :  { %418 = vmatpush.bf16.msra.mxu3 %v970_v16  ;;  %v1118_v14 = vor.u32 %v1258_v11, %v1117_v10  ;;  %v1119_v16 = vld [vmem:[#allocation4 + $0xe8] sm:$0xf0]  ;;  %v1238_v20 = vld [vmem:[#allocation4 + $0x44] sm:$0xf0]  ;;  %v1109_v22 = vld [vmem:[#allocation4 + $0xd0] sm:$0xf] }
  0x2e   :  { %405 = vmatpush.bf16.msra.mxu2 %v906_v12  ;;  %382 = vmatpush.bf16.msra.mxu0 %v878_v44  ;;  %v1122_v18 = vor.u32 %v1257_v15, %v1119_v16  ;;  %v1256_v23 = vld [vmem:[#allocation4 + $0xd4] sm:$0xf0]  ;;  %v1255_v24 = vld [vmem:[#allocation4 + $0xd4] sm:$0xf]  ;;  %v1039_v26 = vld [vmem:[#allocation4 + $0x48] sm:$0xf0]  ;;  %v1038_v31 = vor.u32 %v1238_v20, %v1037_v19 }
  0x2f   :  { %395 = vmatpush.bf16.msra.mxu1 %v942_v45  ;;  %v1110_v28 = vor.u32 %v1256_v23, %v1109_v22  ;;  %v1101_v30 = vld [vmem:[#allocation4 + $0xc0] sm:$0xf]  ;;  %v1254_v32 = vld [vmem:[#allocation4 + $0xc4] sm:$0xf0]  ;;  %v1253_v33 = vld [vmem:[#allocation4 + $0xc4] sm:$0xf] }
  0x30   :  { %v1103_v34 = vld [vmem:[#allocation4 + $0xc8] sm:$0xf0]  ;;  %v1236_v37 = vld [vmem:[#allocation4 + $0x34] sm:$0xf0]  ;;  %v1235_v38 = vld [vmem:[#allocation4 + $0x34] sm:$0xf]  ;;  %v1102_v42 = vor.u32 %v1254_v32, %v1101_v30 }
  0x31   :  { %419 = vmatpush.bf16.msra.mxu3 %v962_v27  ;;  %v1111_v27 = vld [vmem:[#allocation4 + $0xd8] sm:$0xf0]  ;;  %v1106_v43 = vor.u32 %v1253_v33, %v1103_v34  ;;  %v1021_v46 = vld [vmem:[#allocation4 + $0x20] sm:$0xf]  ;;  %v1234_v47 = vld [vmem:[#allocation4 + $0x24] sm:$0xf0] }
  0x32   :  { %406 = vmatpush.bf16.msra.mxu2 %v898_v25  ;;  %629 = vmatpush.bf16.msrb.mxu0 %v1062_v55  ;;  %v1237_v25 = vld [vmem:[#allocation4 + $0x44] sm:$0xf]  ;;  %v1114_v29 = vor.u32 %v1255_v24, %v1111_v27  ;;  %v1031_v39 = vld [vmem:[#allocation4 + $0x38] sm:$0xf0]  ;;  %v165_v50 = vld [vmem:[%s1500_s4] sm:$0x3] }
  0x33   :  { %642 = vmatpush.bf16.msrb.mxu1 %v1126_v4  ;;  %v1042_v35 = vor.u32 %v1237_v25, %v1039_v26  ;;  %v1034_v45 = vor.u32 %v1235_v38, %v1031_v39  ;;  %v1233_v48 = vld [vmem:[#allocation4 + $0x24] sm:$0xf]  ;;  %v167_v53 = vperm.slane %v165_v50, 0  ;;  %v168_v54 = vperm.slane %v165_v50, 1  ;;  %v1252_v4 = vld [vmem:[#allocation4 + $0xb4] sm:$0xf0] }
  0x34   :  { %v1095_v7 = vld [vmem:[#allocation4 + $0xb8] sm:$0xf0]  ;;  %v1013_v9 = vld [vmem:[#allocation4 + $0x10] sm:$0xf]  ;;  %v1232_v10 = vld [vmem:[#allocation4 + $0x14] sm:$0xf0] }
  0x35   :  { %420 = vmatpush.bf16.msra.mxu3 %v954_v40  ;;  %v1231_v11 = vld [vmem:[#allocation4 + $0x14] sm:$0xf]  ;;  %v1085_v15 = vld [vmem:[#allocation4 + $0xa0] sm:$0xf]  ;;  %v1250_v16 = vld [vmem:[#allocation4 + $0xa4] sm:$0xf0] }
  0x36   :  { %407 = vmatpush.bf16.msra.mxu2 %v890_v36  ;;  %630 = vmatpush.bf16.msrb.mxu0 %v1054_v63  ;;  %v1029_v36 = vld [vmem:[#allocation4 + $0x30] sm:$0xf]  ;;  %v1087_v19 = vld [vmem:[#allocation4 + $0xa8] sm:$0xf0]  ;;  %v1230_v22 = vld [vmem:[#allocation4 + $0x4] sm:$0xf0] }
  0x37   :  { %643 = vmatpush.bf16.msrb.mxu1 %v1118_v14  ;;  %v1030_v44 = vor.u32 %v1236_v37, %v1029_v36  ;;  %v1229_v23 = vld [vmem:[#allocation4 + $0x4] sm:$0xf]  ;;  %v1007_v25 = vld [vmem:[#allocation4 + $0x8] sm:$0xf0]  ;;  %v1077_v27 = vld [vmem:[#allocation4 + $0x90] sm:$0xf] }
  0x38   :  { %v1010_v26 = vor.u32 %v1229_v23, %v1007_v25  ;;  %v1247_v30 = vld [vmem:[#allocation4 + $0x94] sm:$0xf]  ;;  %v1069_v33 = vld [vmem:[#allocation4 + $0x80] sm:$0xf]  ;;  %v1246_v34 = vld [vmem:[#allocation4 + $0x84] sm:$0xf0] }
  0x39   :  { %421 = vmatpush.bf16.msra.mxu3 %v946_v51  ;;  %v1022_v51 = vor.u32 %v1234_v47, %v1021_v46  ;;  %v1070_v36 = vor.u32 %v1246_v34, %v1069_v33  ;;  %v1071_v37 = vld [vmem:[#allocation4 + $0x88] sm:$0xf0]  ;;  %v1268_v39 = vld [vmem:[%s1505_s9 + $0x38] sm:$0xff]  ;;  %v1265_v46 = vld [vmem:[%s1505_s9 + $0x20] sm:$0xff] }
  0x3a   :  { %408 = vmatpush.bf16.msra.mxu2 %v882_v49  ;;  %631 = vmatpush.bf16.msrb.mxu0 %v1046_v17  ;;  %v1023_v49 = vld [vmem:[#allocation4 + $0x28] sm:$0xf0]  ;;  %v1249_v17 = vld [vmem:[#allocation4 + $0xa4] sm:$0xf] }
  0x3b   :  { %644 = vmatpush.bf16.msrb.mxu1 %v1110_v28  ;;  %v1026_v52 = vor.u32 %v1233_v48, %v1023_v49  ;;  %v1090_v20 = vor.u32 %v1249_v17, %v1087_v19  ;;  %v1248_v28 = vld [vmem:[#allocation4 + $0x94] sm:$0xf0]  ;;  %v1264_v48 = vld [vmem:[%s1505_s9 + $0x18] sm:$0xff] }
  0x3d   :  { %668 = vmatpush.bf16.msrb.mxu3 %v1130_v5  ;;  %v1251_v5 = vld [vmem:[#allocation4 + $0xb4] sm:$0xf] }
  0x3e   :  { %655 = vmatpush.bf16.msrb.mxu2 %v1066_v59  ;;  %632 = vmatpush.bf16.msrb.mxu0 %v1038_v31  ;;  %v1098_v8 = vor.u32 %v1251_v5, %v1095_v7  ;;  %v1079_v31 = vld [vmem:[#allocation4 + $0x98] sm:$0xf0]  ;;  %v1262_v5 = vld [vmem:[%s1505_s9 + $0x8] sm:$0xff] }
  0x3f   :  { %645 = vmatpush.bf16.msrb.mxu1 %v1102_v42  ;;  %v1082_v32 = vor.u32 %v1247_v30, %v1079_v31  ;;  %v1275_v42 = vld [vmem:[%s1505_s9 + $0x70] sm:$0xff]  ;;  %v1261_v7 = vld [vmem:[%s1505_s9] sm:$0xff] }
  0x40   :  { %v1283_v30 = vld [vmem:[%s1506_s10] ss:$0 sm:$0xff] }
  0x41   :  { %669 = vmatpush.bf16.msrb.mxu3 %v1122_v18  ;;  %v1086_v18 = vor.u32 %v1250_v16, %v1085_v15 }
  0x42   :  { %656 = vmatpush.bf16.msrb.mxu2 %v1058_v3  ;;  %633 = vmatpush.bf16.msrb.mxu0 %v1030_v44  ;;  %v1093_v3 = vld [vmem:[#allocation4 + $0xb0] sm:$0xf]  ;;  %v1274_v44 = vld [vmem:[%s1505_s9 + $0x68] sm:$0xff] }
  0x43   :  { %v1094_v6 = vor.u32 %v1252_v4, %v1093_v3  ;;  %v1263_v3 = vld [vmem:[%s1505_s9 + $0x10] sm:$0xff]  ;;  %v1272_v4 = vld [vmem:[%s1505_s9 + $0x58] sm:$0xff] }
  0x45   :  { %670 = vmatpush.bf16.msrb.mxu3 %v1114_v29  ;;  %646 = vmatpush.bf16.msrb.mxu1 %v1094_v6  ;;  %v1078_v29 = vor.u32 %v1248_v28, %v1077_v27  ;;  %v1271_v6 = vld [vmem:[%s1505_s9 + $0x50] sm:$0xff] }
  0x46   :  { %657 = vmatpush.bf16.msrb.mxu2 %v1050_v21  ;;  %634 = vmatpush.bf16.msrb.mxu0 %v1022_v51  ;;  %v1005_v21 = vld [vmem:[#allocation4] sm:$0xf] }
  0x47   :  { %v1006_v24 = vor.u32 %v1230_v22, %v1005_v21 }
  0x49   :  { %671 = vmatpush.bf16.msrb.mxu3 %v1106_v43  ;;  %647 = vmatpush.bf16.msrb.mxu1 %v1086_v18  ;;  %v1266_v43 = vld [vmem:[%s1505_s9 + $0x28] sm:$0xff] }
  0x4a   :  { %658 = vmatpush.bf16.msrb.mxu2 %v1042_v35  ;;  %v1245_v35 = vld [vmem:[#allocation4 + $0x84] sm:$0xf] }
  0x4b   :  { %v1074_v38 = vor.u32 %v1245_v35, %v1071_v37  ;;  %v1343_v37 = vmov 3.0  }
  0x4c   :  { %1284 = vrcp.f32 %v1343_v37 }
  0x4d   :  { %672 = vmatpush.bf16.msrb.mxu3 %v1098_v8  ;;  %648 = vmatpush.bf16.msrb.mxu1 %v1078_v29  ;;  %v1270_v8 = vld [vmem:[%s1505_s9 + $0x48] sm:$0xff] }
  0x4e   :  { %659 = vmatpush.bf16.msrb.mxu2 %v1034_v45  ;;  %v209_v45 = vld [vmem:[%s1502_s6] sm:$0x3] }
  0x4f   :  { %v211_v47 = vperm.slane %v209_v45, 0 }
  0x51   :  { %673 = vmatpush.bf16.msrb.mxu3 %v1090_v20  ;;  %649 = vmatpush.bf16.msrb.mxu1 %v1070_v36 }
  0x52   :  { %660 = vmatpush.bf16.msrb.mxu2 %v1026_v52 }
  0x55   :  { %674 = vmatpush.bf16.msrb.mxu3 %v1082_v32 }
  0x59   :  { %675 = vmatpush.bf16.msrb.mxu3 %v1074_v38  ;;  %v1285_v38 = vpop.eup %1284 }
  0x5a   :  { %vm852_vm6 = vweird.f32 %v1285_v38 }
  0x9b   :  { %v113_v13 = vpop.f32.mrf.mxu3 }
  0x9c   :  { %v100_v12 = vpop.f32.mrf.mxu2 }
  0xa3   :  { %v115_v41 = vpop.f32.mrf.mxu3 }
  0xa4   :  { %v102_v40 = vpop.f32.mrf.mxu2  ;;  %v1267_v41 = vld [vmem:[%s1505_s9 + $0x30] sm:$0xff] }
  0xa5   :  { %v1276_v40 = vld [vmem:[%s1505_s9 + $0x78] sm:$0xff] }
  0xab   :  { %v161_v56 = vpop.f32.mrf.mxu3 }
  0xac   :  { %v148_v55 = vpop.f32.mrf.mxu2  ;;  %v162_v58 = vadd.f32 %v161_v56, %v113_v13  ;;  %v1015_v13 = vld [vmem:[#allocation4 + $0x18] sm:$0xf0] }
  0xad   :  { %v149_v57 = vadd.f32 %v148_v55, %v100_v12  ;;  %v1014_v12 = vor.u32 %v1232_v10, %v1013_v9  ;;  %v1018_v14 = vor.u32 %v1231_v11, %v1015_v13  ;;  %v1269_v9 = vld [vmem:[%s1505_s9 + $0x40] sm:$0xff] }
  0xae   :  { %v172_v60 = vadd.f32 %v168_v54, %v162_v58  ;;  %v463_v10 = vld [vmem:[%s1504_s8] sm:$0x3] }
  0xaf   :  { %v171_v59 = vadd.f32 %v167_v53, %v149_v57  ;;  %635 = vmatpush.bf16.msrb.mxu0 %v1014_v12  ;;  %661 = vmatpush.bf16.msrb.mxu2 %v1018_v14  ;;  %v212_v53 = vperm.slane %v209_v45, 1  ;;  %v465_v12 = vperm.slane %v463_v10, 0  ;;  %v466_v17 = vperm.slane %v463_v10, 1 }
  0xb0   :  { %v174_v62 = vmax.f32 %v172_v60, 0.0 }
  0xb1   :  { %v173_v61 = vmax.f32 %v171_v59, 0.0 }
  0xb2   :  { %v176_v0 = vpack.c.bf16 %v174_v62, %v174_v62 }
  0xb3   :  { %v175_v63 = vpack.c.bf16 %v173_v61, %v173_v61  ;;  %v163_v2 = vpop.f32.mrf.mxu3  ;;  %636 = vmatpush.bf16.msrb.mxu0 %v1006_v24  ;;  %662 = vmatpush.bf16.msrb.mxu2 %v1010_v26 }
  0xb4   :  { %v150_v1 = vpop.f32.mrf.mxu2  ;;  %396 = vmatmul.bf16.vlgmr.msra.gmra.mxu1 %v176_v0  ;;  %422 = vmatmul.bf16.vlgmr.msra.gmra.mxu3 %v176_v0  ;;  %v1273_v2 = vld [vmem:[%s1505_s9 + $0x60] sm:$0xff] }
  0xb5   :  { %383 = vmatmul.bf16.vlgmr.msra.gmra.mxu0 %v175_v63  ;;  %409 = vmatmul.bf16.vlgmr.msra.gmra.mxu2 %v175_v63 }
  0xb6   :  { %830 = vmatpush.bf16.msra.mxu1 %v1276_v40 }
  0xb7   :  { %817 = vmatpush.bf16.msra.mxu0 %v1268_v39  ;;  %v848_v39 = vmul.f32 3.0, %v1285_v38 }
  0xb9   :  { %v849_v40 = vsub.f32 1.0, %v848_v39 }
  0xba   :  { %831 = vmatpush.bf16.msra.mxu1 %v1275_v42 }
  0xbb   :  { %818 = vmatpush.bf16.msra.mxu0 %v1267_v41  ;;  %v850_v41 = vmul.f32 %v1285_v38, %v849_v40 }
  0xbd   :  { %v851_v42 = vadd.f32 %v1285_v38, %v850_v41 }
  0xbe   :  { %832 = vmatpush.bf16.msra.mxu1 %v1274_v44 }
  0xbf   :  { %819 = vmatpush.bf16.msra.mxu0 %v1266_v43  ;;  %v853_v43 = vsel %vm852_vm6, %v1285_v38, %v851_v42 }
  0xc2   :  { %833 = vmatpush.bf16.msra.mxu1 %v1273_v2 }
  0xc3   :  { %820 = vmatpush.bf16.msra.mxu0 %v1265_v46 }
  0xc6   :  { %834 = vmatpush.bf16.msra.mxu1 %v1272_v4 }
  0xc7   :  { %821 = vmatpush.bf16.msra.mxu0 %v1264_v48 }
  0xca   :  { %835 = vmatpush.bf16.msra.mxu1 %v1271_v6 }
  0xcb   :  { %822 = vmatpush.bf16.msra.mxu0 %v1263_v3 }
  0xce   :  { %836 = vmatpush.bf16.msra.mxu1 %v1270_v8 }
  0xcf   :  { %823 = vmatpush.bf16.msra.mxu0 %v1262_v5 }
  0xd2   :  { %837 = vmatpush.bf16.msra.mxu1 %v1269_v9 }
  0xd3   :  { %824 = vmatpush.bf16.msra.mxu0 %v1261_v7 }
 0x131   :  { %v397_v50 = vpop.f32.mrf.mxu1 }
 0x132   :  { %v384_v49 = vpop.f32.mrf.mxu0 }
 0x133   :  { %v385_v51 = vadd.f32 %v384_v49, %v211_v47 }
 0x135   :  { %v398_v52 = vadd.f32 %v397_v50, %v385_v51 }
 0x137   :  { %v427_v54 = vmax.f32 %v398_v52, 0.0  ;;  %v423_v57 = vpop.f32.mrf.mxu3 }
 0x138   :  { %v410_v56 = vpop.f32.mrf.mxu2 }
 0x139   :  { %v429_v55 = vpack.c.bf16 %v427_v54, %v427_v54  ;;  %v411_v58 = vadd.f32 %v410_v56, %v212_v53  ;;  %v399_v60 = vpop.f32.mrf.mxu1 }
 0x13a   :  { %v386_v59 = vpop.f32.mrf.mxu0 }
 0x13b   :  { %637 = vmatmul.bf16.vlgmr.msrb.gmra.mxu0 %v429_v55  ;;  %663 = vmatmul.bf16.vlgmr.msrb.gmra.mxu2 %v429_v55  ;;  %v424_v61 = vadd.f32 %v423_v57, %v411_v58 }
 0x13d   :  { %v428_v62 = vmax.f32 %v424_v61, 0.0 }
 0x13f   :  { %v430_v63 = vpack.c.bf16 %v428_v62, %v428_v62  ;;  %v425_v1 = vpop.f32.mrf.mxu3 }
 0x140   :  { %v412_v0 = vpop.f32.mrf.mxu2 }
 0x141   :  { %650 = vmatmul.bf16.vlgmr.msrb.gmra.mxu1 %v430_v63  ;;  %676 = vmatmul.bf16.vlgmr.msrb.gmra.mxu3 %v430_v63 }
 0x1b8   :  { %v638_v11 = vpop.f32.mrf.mxu0 }
 0x1b9   :  { %v639_v13 = vadd.f32 %v638_v11, %v465_v12 }
 0x1be   :  { %v664_v14 = vpop.f32.mrf.mxu2  ;;  %v651_v15 = vpop.f32.mrf.mxu1 }
 0x1bf   :  { %v652_v16 = vadd.f32 %v651_v15, %v639_v13  ;;  %v665_v21 = vadd.f32 %v664_v14, %v466_v17 }
 0x1c0   :  { %v640_v18 = vpop.f32.mrf.mxu0 }
 0x1c1   :  { %v681_v19 = vmax.f32 %v652_v16, 0.0 }
 0x1c3   :  { %v683_v20 = vpack.c.bf16 %v681_v19, %v681_v19 }
 0x1c4   :  { %v677_v22 = vpop.f32.mrf.mxu3 }
 0x1c5   :  { %v678_v23 = vadd.f32 %v677_v22, %v665_v21  ;;  %825 = vmatmul.bf16.vlgmr.msra.gmra.mxu0 %v683_v20 }
 0x1c6   :  { %v666_v24 = vpop.f32.mrf.mxu2  ;;  %v653_v25 = vpop.f32.mrf.mxu1 }
 0x1c7   :  { %v682_v26 = vmax.f32 %v678_v23, 0.0 }
 0x1c9   :  { %v684_v27 = vpack.c.bf16 %v682_v26, %v682_v26 }
 0x1cb   :  { %838 = vmatmul.bf16.vlgmr.msra.gmra.mxu1 %v684_v27 }
 0x1cc   :  { %v679_v28 = vpop.f32.mrf.mxu3 }
 0x242   :  { %v826_v29 = vpop.f32.mrf.mxu0 }
 0x243   :  { %v827_v31 = vadd.f32 %v1283_v30, %v826_v29 }
 0x248   :  { %v839_v32 = vpop.f32.mrf.mxu1 }
 0x249   :  { %v840_v33 = vadd.f32 %v839_v32, %v827_v31 }
 0x24a   :  { %v828_v34 = vpop.f32.mrf.mxu0 }
 0x24b   :  { %v844_v35 = vsel %vm843_vm5, %v840_v33, 0.0 }
 0x24c   :  { %845 = vadd.xlane.f32.xlu0 %v844_v35 }
 0x250   :  { %v841_v36 = vpop.f32.mrf.mxu1 }
 0x2bf   :  { %v846_v44 = vpop.xlane.xlu0 %845 }
 0x2c0   :  { %v854_v45 = vmul.f32 %v853_v43, %v846_v44 }
 0x2c2   :  { %856 = vst.msk [vmem:[%s1507_s11] sm:$0x3] %vm855_vm7, %v854_v45 }
 0x2c3   :  { %861 = vsyncpa [#allocation3], 1 }
 0x2c4   :  { %862 = vsyncpa [#allocation5], 1 }

</bundles_post_ra>
